<compile_context>
chip_gen: v7x
topology: tpu7x:2x2x1
jax: 0.10.0
libtpu: 0.0.40
codegen_flags: <defaults>
</compile_context>

<pallas_src>
import functools
import math

import jax
import jax.numpy as jnp
from jax.experimental import pallas as pl
from jax.experimental.pallas import tpu as pltpu

_EPS = 1e-8
_RAD2DEG = 180.0 / math.pi

# Abramowitz & Stegun 4.4.45 polynomial for acos(x), |abs err| <= ~2e-8 rad on
# [0, 1] (f32-accurate).  Used because lax.acos has no guaranteed Mosaic
# lowering; built only from sqrt/mul/add/where.
_ACOS_COEFFS = (
    1.5707963050, -0.2145988016, 0.0889789874, -0.0501743046,
    0.0308918810, -0.0170881256, 0.0066700901, -0.0012624911,
)


def _acos_f32(x):
    """f32-accurate arccos from sqrt/mul/add/where (Mosaic-safe)."""
    ax = jnp.abs(x)
    p = jnp.float32(_ACOS_COEFFS[-1])
    for c in _ACOS_COEFFS[-2::-1]:            # Horner
        p = p * ax + jnp.float32(c)
    r = jnp.sqrt(jnp.maximum(1.0 - ax, 0.0)) * p
    # Sign test must use x itself (not |x|); keep this ordering.
    return jnp.where(x < 0.0, jnp.float32(math.pi) - r, r)


def _round_up(x, m):
    return ((x + m - 1) // m) * m


def _angular_arccos_loss_kernel(o_ref, t_ref, loss_ref, acc_ref, *,
                                valid_b, g_total, tile_g, steps_per_core,
                                need_g_mask, need_b_mask, scale):
    """Per-tile cosine-sim -> clamp -> acos -> masked accumulate.

    Inputs are (D, 8, tile_g): tiny D (2-3) leading, batch repacked dense onto
    sublanes x lanes.  Partial sums accumulate into an (8, tile_g) VMEM
    scratch; the final step of each core's sub-grid does the single cross-lane
    reduce, scales by 180/(pi*B), and broadcasts into its (8, 128) output
    block (lane-dense, unmasked store).
    """
    c = pl.program_id(0)          # per-core partial-sum index ("parallel")
    i = pl.program_id(1)          # lane-tile index within this core ("arbitrary")

    @pl.when(i == 0)
    def _():
        acc_ref[...] = jnp.zeros_like(acc_ref)
        loss_ref[...] = jnp.zeros_like(loss_ref)

    o = o_ref[...].astype(jnp.float32)          # (D, 8, tile_g) f32 math (v5e: no bf16 VPU/EUP)
    t = t_ref[...].astype(jnp.float32)

    # D <= 3: these reduce to a couple of dense VPU adds on (8, tile_g) vregs.
    dot = jnp.sum(o * t, axis=0)                # (8, tile_g)
    oss = jnp.sum(o * o, axis=0)                # ||o||^2
    tss = jnp.sum(t * t, axis=0)                # ||t||^2

    # F.normalize(x, eps) followed by cosine_similarity collapses (for
    # ||x|| >= eps) to dot(o,t) * rsqrt(||o||^2 * ||t||^2).  The single fused
    # EUP rsqrt is capped at 1/eps^2; this differs from PyTorch only for
    # degenerate rows with ||x|| < 1e-8 (already documented divergence).
    inv = jnp.minimum(jax.lax.rsqrt(oss * tss), jnp.float32(1.0 / (_EPS * _EPS)))
    # F.hardtanh_(sim, -1 + 1e-8, 1 - 1e-8)
    sim = jnp.clip(dot * inv, -1.0 + _EPS, 1.0 - _EPS)
    ang = _acos_f32(sim)                        # (8, tile_g) radians

    # Masks are statically elided when no padding / ragged tail / phantom tile
    # exists (the common aligned large-batch case compiles with zero mask ops).
    if need_g_mask or need_b_mask:
        tile = c * steps_per_core + i
        g = jax.lax.broadcasted_iota(jnp.int32, ang.shape, 1) + tile * tile_g
        valid = None
        if need_g_mask:
            # Lanes past the (possibly ragged) end of the repacked lane axis,
            # including fully-phantom tiles on the 2-wide core axis.
            valid = g < g_total
        if need_b_mask:
            # Zero/garbage-padded batch columns (at most 7 for large B).
            s = jax.lax.broadcasted_iota(jnp.int32, ang.shape, 0)
            col_ok = (s * g_total + g) < valid_b
            valid = col_ok if valid is None else jnp.logical_and(valid, col_ok)
        ang = jnp.where(valid, ang, jnp.float32(0.0))

    acc_ref[...] += ang

    @pl.when(i == steps_per_core - 1)
    def _():
        total = jnp.sum(acc_ref[...], keepdims=True) * jnp.float32(scale)  # (1,1)
        loss_ref[...] = jnp.broadcast_to(total, loss_ref.shape)            # (8,128)


def _loss_jax(pred, tgt):
    """Pure-JAX forward matching the PyTorch module (cartesian branch).

    Also used as the small-batch fast path and as the test reference.
    """
    p = pred.astype(jnp.float32)
    t = tgt.astype(jnp.float32)
    pv = p / jnp.maximum(jnp.linalg.norm(p, axis=1, keepdims=True), _EPS)
    tv = t / jnp.maximum(jnp.linalg.norm(t, axis=1, keepdims=True), _EPS)
    dot = jnp.sum(pv * tv, axis=1)
    den = (jnp.maximum(jnp.linalg.norm(pv, axis=1), _EPS)
           * jnp.maximum(jnp.linalg.norm(tv, axis=1), _EPS))
    sim = jnp.clip(dot / den, -1.0 + _EPS, 1.0 - _EPS)
    return jnp.mean(jnp.arccos(sim)) * _RAD2DEG


def angular_arccos_loss(output, target, *, compute_only_2d=False, data_id=None,
                        block_b=256 * 1024, use_pallas=None):
    """JAX/Pallas equivalent of AngularArcossLoss.forward (cartesian branch).

    block_b = batch elements per grid step (tune ~96-128K on v5e, 192-256K on
    v6e/v7x; default fits comfortably inside the default scoped VMEM).
    """
    if "cartesian" in output:
        pred = output["cartesian"]
    elif "spherical" in output:
        # TODO(synk): spherical branch needs spherical2cartesial, which is not
        # defined in the reference module source; only 'cartesian' is supported.
        raise NotImplementedError("spherical branch not implemented")
    else:
        raise ValueError("Output must contain either cartesian or spherical keys")

    tgt = target
    if compute_only_2d and data_id in (4, 9, 10):
        pred = pred[:, :2]
        tgt = tgt[:, :2]

    B, D = pred.shape
    assert tgt.shape == (B, D)

    if use_pallas is None:
        use_pallas = B >= 32768
    if not use_pallas:
        # Small-batch fast path: kernel launch + layout plumbing would dominate.
        return _loss_jax(pred, tgt)

    # ---- Pallas path -------------------------------------------------------
    # TODO(synk): produce [D, B] (or [D, 8, B/8]) upstream to drop this
    # transpose copy; it is the only remaining extra HBM pass.
    pred_t = jnp.transpose(pred)                  # [D, B]
    tgt_t = jnp.transpose(tgt)

    # Pad only to a multiple of 8 (sublane repack), with a 1024 floor so the
    # lane axis always holds at least one full 128-lane tile.  Padded columns
    # are masked in-kernel; for large B the pad is <= 7 columns (usually 0).
    bp = max(_round_up(B, 8), 1024)
    if bp != B:
        pad = ((0, 0), (0, bp - B))
        pred_t = jnp.pad(pred_t, pad)
        tgt_t = jnp.pad(tgt_t, pad)

    # Sublane-dense repack: [D, Bp] -> [D, 8, G] (free row-major reshape).
    g_total = bp // 8
    pred_r = pred_t.reshape(D, 8, g_total)
    tgt_r = tgt_t.reshape(D, 8, g_total)

    tile_g = min(_round_up(g_total, 128),
                 _round_up(max(block_b // 8, 128), 128))
    n_tiles = -(-g_total // tile_g)
    n_cores = 2 if n_tiles >= 2 else 1            # v7x: use both TensorCores
    steps_per_core = -(-n_tiles // n_cores)
    covered = n_cores * steps_per_core * tile_g
    need_g_mask = covered != g_total              # ragged tail and/or phantom tile
    need_b_mask = bp != B                         # zero-padded batch columns
    assert bp + tile_g < 2 ** 31                  # int32 column index in-kernel

    kernel = functools.partial(
        _angular_arccos_loss_kernel,
        valid_b=B, g_total=g_total, tile_g=tile_g, steps_per_core=steps_per_core,
        need_g_mask=need_g_mask, need_b_mask=need_b_mask,
        scale=_RAD2DEG / float(B))

    def in_map(c, i):
        # Clamp phantom trailing tiles (odd tile count split over 2 cores) onto
        # the last real tile; their contribution is zeroed by the g-mask.
        return (0, 0, jnp.minimum(c * steps_per_core + i, n_tiles - 1))

    itemsize = pred_r.dtype.itemsize
    vmem_need = 2 * 2 * D * 8 * tile_g * itemsize + 8 * tile_g * 4
    vmem_limit = int(min(max(32 << 20, vmem_need + (8 << 20)), 48 << 20))

    partials = pl.pallas_call(
        kernel,
        out_shape=jax.ShapeDtypeStruct((n_cores * 8, 128), jnp.float32),
        grid_spec=pltpu.PrefetchScalarGridSpec(
            num_scalar_prefetch=0,
            grid=(n_cores, steps_per_core),
            in_specs=[
                pl.BlockSpec((D, 8, tile_g), in_map),
                pl.BlockSpec((D, 8, tile_g), in_map),
            ],
            out_specs=pl.BlockSpec((8, 128), lambda c, i: (c, 0)),
            scratch_shapes=[pltpu.VMEM((8, tile_g), jnp.float32)],
        ),
        compiler_params=pltpu.CompilerParams(
            dimension_semantics=("parallel", "arbitrary"),
            vmem_limit_bytes=vmem_limit),
    )(pred_r, tgt_r)

    # Each core broadcast its (already 180/(pi*B)-scaled) partial sum over its
    # (8,128) output block; take one lane per core and add.
    return jnp.sum(partials.reshape(n_cores, 8, 128)[:, 0, 0])


if __name__ == "__main__":
    def run_case(name, key, B, D, *, block_b=256 * 1024,
                 compute_only_2d=False, data_id=None):
        k1, k2 = jax.random.split(key)
        pred = jax.random.normal(k1, (B, D), dtype=jnp.float32)
        target = jax.random.normal(k2, (B, D), dtype=jnp.float32)
        output = {"cartesian": pred}               # mimics the module's dict input

        loss = angular_arccos_loss(output, target, compute_only_2d=compute_only_2d,
                                   data_id=data_id, block_b=block_b,
                                   use_pallas=True)
        loss = jax.block_until_ready(loss)

        if compute_only_2d and data_id in (4, 9, 10):
            p_ref, t_ref = pred[:, :2], target[:, :2]
        else:
            p_ref, t_ref = pred, target
        ref = jax.block_until_ready(_loss_jax(p_ref, t_ref))

        assert jnp.isfinite(loss), (name, float(loss))
        assert abs(float(loss) - float(ref)) < 2e-3, (name, float(loss), float(ref))

    keys = jax.random.split(jax.random.PRNGKey(0), 4)
    # Small gaze batch (single tile, batch-pad mask path).
    run_case("small", keys[0], 16, 3)
    # Multi-tile, 2-wide core axis, per-core accumulation, exact tiling (no masks).
    run_case("multi_tile", keys[1], 4096, 3, block_b=1024)
    # Ragged lane tail + phantom tile on the core axis + batch padding.
    run_case("ragged", keys[2], 3003, 3, block_b=1024)
    # compute_only_2d slicing branch.
    run_case("only2d", keys[3], 16, 3, compute_only_2d=True, data_id=4)

    print("KERNEL_OK")
</pallas_src>

<mosaic_0001>
module attributes {stable_mosaic.version = 11 : i64} {
  func.func @_angular_arccos_loss_kernel(%arg0: i32, %arg1: i32, %arg2: memref<3x8x128xf32, #tpu.memory_space<vmem>>, %arg3: memref<3x8x128xf32, #tpu.memory_space<vmem>>, %arg4: memref<8x128xf32, #tpu.memory_space<vmem>>, %arg5: memref<8x128xf32, #tpu.memory_space<vmem>>) attributes {dimension_semantics = [#tpu.dimension_semantics<parallel>, #tpu.dimension_semantics<arbitrary>], iteration_bounds = array<i64: 1, 1>, scalar_prefetch = 0 : i64, scratch_operands = 1 : i64, tpu.core_type = #tpu.core_type<tc>, window_params = [{transform_indices = @transform_0, window_bounds = array<i64: 3, 8, 128>}, {transform_indices = @transform_1, window_bounds = array<i64: 3, 8, 128>}, {transform_indices = @transform_2, window_bounds = array<i64: 8, 128>}]} {
    %c0_i32 = arith.constant 0 : i32
    %0 = arith.cmpi eq, %arg1, %c0_i32 : i32
    %1 = arith.extui %0 : i1 to i32
    %c0_i32_0 = arith.constant 0 : i32
    %2 = arith.cmpi ne, %1, %c0_i32_0 : i32
    scf.if %2 {
      %cst_31 = arith.constant 0.000000e+00 : f32
      %74 = vector.broadcast %cst_31 : f32 to vector<8x128xf32>
      %c0_32 = arith.constant 0 : index
      %c0_33 = arith.constant 0 : index
      %75 = vector.load %arg5[%c0_32, %c0_33] : memref<8x128xf32, #tpu.memory_space<vmem>>, vector<8x128xf32>
      tpu.vector_store %arg5[%c0_32, %c0_33], %74 {strides = array<i32>} : memref<8x128xf32, #tpu.memory_space<vmem>>, vector<8x128xf32>,
      %cst_34 = arith.constant 0.000000e+00 : f32
      %76 = vector.broadcast %cst_34 : f32 to vector<8x128xf32>
      %c0_35 = arith.constant 0 : index
      %c0_36 = arith.constant 0 : index
      %77 = vector.load %arg4[%c0_35, %c0_36] : memref<8x128xf32, #tpu.memory_space<vmem>>, vector<8x128xf32>
      tpu.vector_store %arg4[%c0_35, %c0_36], %76 {strides = array<i32>} : memref<8x128xf32, #tpu.memory_space<vmem>>, vector<8x128xf32>,
    } else {
    }
    %c0 = arith.constant 0 : index
    %c0_1 = arith.constant 0 : index
    %c0_2 = arith.constant 0 : index
    %3 = vector.load %arg2[%c0, %c0_1, %c0_2] : memref<3x8x128xf32, #tpu.memory_space<vmem>>, vector<3x8x128xf32>
    %c0_3 = arith.constant 0 : index
    %c0_4 = arith.constant 0 : index
    %c0_5 = arith.constant 0 : index
    %4 = vector.load %arg3[%c0_3, %c0_4, %c0_5] : memref<3x8x128xf32, #tpu.memory_space<vmem>>, vector<3x8x128xf32>
    %5 = arith.mulf %3, %4 : vector<3x8x128xf32>
    %cst = arith.constant dense<0.000000e+00> : vector<8x128xf32>
    %6 = vector.multi_reduction <add>, %5, %cst [0] : vector<3x8x128xf32> to vector<8x128xf32>
    %7 = arith.mulf %3, %3 : vector<3x8x128xf32>
    %cst_6 = arith.constant dense<0.000000e+00> : vector<8x128xf32>
    %8 = vector.multi_reduction <add>, %7, %cst_6 [0] : vector<3x8x128xf32> to vector<8x128xf32>
    %9 = arith.mulf %4, %4 : vector<3x8x128xf32>
    %cst_7 = arith.constant dense<0.000000e+00> : vector<8x128xf32>
    %10 = vector.multi_reduction <add>, %9, %cst_7 [0] : vector<3x8x128xf32> to vector<8x128xf32>
    %11 = arith.mulf %8, %10 : vector<8x128xf32>
    %12 = math.rsqrt %11 : vector<8x128xf32>
    %cst_8 = arith.constant 1.000000e+16 : f32
    %13 = vector.broadcast %cst_8 : f32 to vector<8x128xf32>
    %14 = arith.minimumf %12, %13 : vector<8x128xf32>
    %15 = arith.mulf %6, %14 : vector<8x128xf32>
    %cst_9 = arith.constant -1.000000e+00 : f32
    %cst_10 = arith.constant 1.000000e+00 : f32
    %16 = vector.broadcast %cst_9 : f32 to vector<8x128xf32>
    %17 = arith.maximumf %16, %15 : vector<8x128xf32>
    %18 = vector.broadcast %cst_10 : f32 to vector<8x128xf32>
    %19 = arith.minimumf %18, %17 : vector<8x128xf32>
    %20 = math.absf %19 : vector<8x128xf32>
    %cst_11 = arith.constant -0.0012624911 : f32
    %21 = vector.broadcast %cst_11 : f32 to vector<8x128xf32>
    %22 = arith.mulf %21, %20 : vector<8x128xf32>
    %cst_12 = arith.constant 6.670090e-03 : f32
    %23 = vector.broadcast %cst_12 : f32 to vector<8x128xf32>
    %24 = arith.addf %22, %23 : vector<8x128xf32>
    %25 = arith.mulf %24, %20 : vector<8x128xf32>
    %cst_13 = arith.constant -0.0170881264 : f32
    %26 = vector.broadcast %cst_13 : f32 to vector<8x128xf32>
    %27 = arith.addf %25, %26 : vector<8x128xf32>
    %28 = arith.mulf %27, %20 : vector<8x128xf32>
    %cst_14 = arith.constant 0.0308918804 : f32
    %29 = vector.broadcast %cst_14 : f32 to vector<8x128xf32>
    %30 = arith.addf %28, %29 : vector<8x128xf32>
    %31 = arith.mulf %30, %20 : vector<8x128xf32>
    %cst_15 = arith.constant -0.0501743034 : f32
    %32 = vector.broadcast %cst_15 : f32 to vector<8x128xf32>
    %33 = arith.addf %31, %32 : vector<8x128xf32>
    %34 = arith.mulf %33, %20 : vector<8x128xf32>
    %cst_16 = arith.constant 0.0889789909 : f32
    %35 = vector.broadcast %cst_16 : f32 to vector<8x128xf32>
    %36 = arith.addf %34, %35 : vector<8x128xf32>
    %37 = arith.mulf %36, %20 : vector<8x128xf32>
    %cst_17 = arith.constant -0.214598805 : f32
    %38 = vector.broadcast %cst_17 : f32 to vector<8x128xf32>
    %39 = arith.addf %37, %38 : vector<8x128xf32>
    %40 = arith.mulf %39, %20 : vector<8x128xf32>
    %cst_18 = arith.constant 1.57079625 : f32
    %41 = vector.broadcast %cst_18 : f32 to vector<8x128xf32>
    %42 = arith.addf %40, %41 : vector<8x128xf32>
    %cst_19 = arith.constant 1.000000e+00 : f32
    %43 = vector.broadcast %cst_19 : f32 to vector<8x128xf32>
    %44 = arith.subf %43, %20 : vector<8x128xf32>
    %cst_20 = arith.constant 0.000000e+00 : f32
    %45 = vector.broadcast %cst_20 : f32 to vector<8x128xf32>
    %46 = arith.maximumf %44, %45 : vector<8x128xf32>
    %47 = math.sqrt %46 : vector<8x128xf32>
    %48 = arith.mulf %47, %42 : vector<8x128xf32>
    %cst_21 = arith.constant 0.000000e+00 : f32
    %49 = vector.broadcast %cst_21 : f32 to vector<8x128xf32>
    %50 = arith.cmpf olt, %19, %49 : vector<8x128xf32>
    %cst_22 = arith.constant 3.14159274 : f32
    %51 = vector.broadcast %cst_22 : f32 to vector<8x128xf32>
    %52 = arith.subf %51, %48 : vector<8x128xf32>
    %53 = arith.select %50, %52, %48 : vector<8x128xi1>, vector<8x128xf32>
    %c1_i32 = arith.constant 1 : i32
    %54 = arith.muli %arg0, %c1_i32 : i32
    %55 = arith.addi %54, %arg1 : i32
    %56 = tpu.iota {dimensions = array<i32: 1>} : vector<8x128xi32>
    %c128_i32 = arith.constant 128 : i32
    %57 = arith.muli %55, %c128_i32 : i32
    %58 = vector.broadcast %57 : i32 to vector<8x128xi32>
    %59 = arith.addi %56, %58 : vector<8x128xi32>
    %60 = tpu.iota {dimensions = array<i32: 0>} : vector<8x128xi32>
    %c128_i32_23 = arith.constant 128 : i32
    %61 = vector.broadcast %c128_i32_23 : i32 to vector<8x128xi32>
    %62 = arith.muli %60, %61 : vector<8x128xi32>
    %63 = arith.addi %62, %59 : vector<8x128xi32>
    %c16_i32 = arith.constant 16 : i32
    %64 = vector.broadcast %c16_i32 : i32 to vector<8x128xi32>
    %65 = arith.cmpi slt, %63, %64 : vector<8x128xi32>
    %cst_24 = arith.constant 0.000000e+00 : f32
    %66 = vector.broadcast %cst_24 : f32 to vector<8x128xf32>
    %67 = arith.select %65, %53, %66 : vector<8x128xi1>, vector<8x128xf32>
    %c0_25 = arith.constant 0 : index
    %c0_26 = arith.constant 0 : index
    %68 = vector.load %arg5[%c0_25, %c0_26] : memref<8x128xf32, #tpu.memory_space<vmem>>, vector<8x128xf32>
    %69 = arith.addf %68, %67 : vector<8x128xf32>
    %c0_27 = arith.constant 0 : index
    %c0_28 = arith.constant 0 : index
    %70 = vector.load %arg5[%c0_27, %c0_28] : memref<8x128xf32, #tpu.memory_space<vmem>>, vector<8x128xf32>
    tpu.vector_store %arg5[%c0_27, %c0_28], %69 {strides = array<i32>} : memref<8x128xf32, #tpu.memory_space<vmem>>, vector<8x128xf32>,
    %c0_i32_29 = arith.constant 0 : i32
    %71 = arith.cmpi eq, %arg1, %c0_i32_29 : i32
    %72 = arith.extui %71 : i1 to i32
    %c0_i32_30 = arith.constant 0 : i32
    %73 = arith.cmpi ne, %72, %c0_i32_30 : i32
    scf.if %73 {
      %c0_31 = arith.constant 0 : index
      %c0_32 = arith.constant 0 : index
      %74 = vector.load %arg5[%c0_31, %c0_32] : memref<8x128xf32, #tpu.memory_space<vmem>>, vector<8x128xf32>
      %75 = vector.shape_cast %74 : vector<8x128xf32> to vector<1x8x128xf32>
      %cst_33 = arith.constant dense<0.000000e+00> : vector<1xf32>
      %76 = vector.multi_reduction <add>, %75, %cst_33 [1, 2] : vector<1x8x128xf32> to vector<1xf32>
      %77 = vector.shape_cast %76 : vector<1xf32> to vector<1x1x1xf32>
      %78 = vector.extract %77[0, 0, 0] : f32 from vector<1x1x1xf32>
      %79 = vector.broadcast %78 : f32 to vector<1x1xf32>
      %cst_34 = arith.constant 3.58098626 : f32
      %80 = vector.broadcast %cst_34 : f32 to vector<1x1xf32>
      %81 = arith.mulf %79, %80 : vector<1x1xf32>
      %82 = vector.shape_cast %81 : vector<1x1xf32> to vector<1x1xf32>
      %83 = vector.broadcast %82 : vector<1x1xf32> to vector<8x128xf32>
      %c0_35 = arith.constant 0 : index
      %c0_36 = arith.constant 0 : index
      %84 = vector.load %arg4[%c0_35, %c0_36] : memref<8x128xf32, #tpu.memory_space<vmem>>, vector<8x128xf32>
      tpu.vector_store %arg4[%c0_35, %c0_36], %83 {strides = array<i32>} : memref<8x128xf32, #tpu.memory_space<vmem>>, vector<8x128xf32>,
    } else {
    }
    return
  }
  func.func @transform_0(%arg0: i32, %arg1: i32) -> (i32, i32, i32) {
    %c1_i32 = arith.constant 1 : i32
    %0 = arith.muli %arg0, %c1_i32 : i32
    %1 = arith.addi %0, %arg1 : i32
    %c0_i32 = arith.constant 0 : i32
    %2 = arith.minsi %1, %c0_i32 : i32
    %c0_i32_0 = arith.constant 0 : i32
    %c0_i32_1 = arith.constant 0 : i32
    %c0_i32_2 = arith.constant 0 : i32
    return %c0_i32_0, %c0_i32_1, %2 : i32, i32, i32
  }
  func.func @transform_1(%arg0: i32, %arg1: i32) -> (i32, i32, i32) {
    %c1_i32 = arith.constant 1 : i32
    %0 = arith.muli %arg0, %c1_i32 : i32
    %1 = arith.addi %0, %arg1 : i32
    %c0_i32 = arith.constant 0 : i32
    %2 = arith.minsi %1, %c0_i32 : i32
    %c0_i32_0 = arith.constant 0 : i32
    %c0_i32_1 = arith.constant 0 : i32
    %c0_i32_2 = arith.constant 0 : i32
    return %c0_i32_0, %c0_i32_1, %2 : i32, i32, i32
  }
  func.func @transform_2(%arg0: i32, %arg1: i32) -> (i32, i32) {
    %c0_i32 = arith.constant 0 : i32
    %c0_i32_0 = arith.constant 0 : i32
    return %arg0, %c0_i32 : i32, i32
  }
}

</mosaic_0001>

<bundles_post_ra>
// kernel: tpu_custom_call.1
= control target key start
LH: loop header
LB: loop body
LE: loop exit
PB: predicated region body
PF: predicated region fallthrough
CT: control target
= control target key end

     0   :  { %7 = vsyncpa [#allocation4], 0  ;;  %s309_s0 = inlined_call_operand.hbm [shape: f32[3,8,128], index: 0, kind: input, shape index: {}]   ;;  %s310_s1 = inlined_call_operand.hbm [shape: f32[3,8,128], index: 1, kind: input, shape index: {}]   ;;  %s311_s2 = inlined_call_operand.hbm [shape: f32[8,128], index: 2, kind: output, shape index: {}]  }
   0x1   :  { %8 = vsyncpa [#allocation7], 0 }
   0x2   :  { %9 = vsyncpa [#allocation5], 0  ;;  %s253_s9 = smov [#allocation3]   ;;  %s181_s13 = scalar_lea.hbm %s309_s0, 384 }
   0x3   :  { %s20_s10 = sshll.u32 %s253_s9, 4  ;;  %p182_p0 = scmp.ne.s32.totalorder %s309_s0, %s181_s13  ;;  %s21_s10 = int_to_ptr.vmem [resolvable:$true] %s20_s10 }
   0x4   :  { %p185_p1 = scmp.lt.u32.totalorder %s181_s13, %s309_s0 }
   0x6   :  { %p187_p2 = pnand %p185_p1, %p182_p0 }
   0x8   :  { %190 = shalt.err (!%p187_p2)
}
   0x9   :  { %s191_s18 = scalar_lea.vmem %s21_s10, 384  ;;  %p196_p4 = scmp.lt.s32.totalorder %s21_s10, %s21_s10 }
   0xa   :  { %p192_p3 = scmp.ne.s32.totalorder %s21_s10, %s191_s18  ;;  %p197_p5 = scmp.lt.s32.totalorder %s191_s18, %s191_s18 }
   0xc   :  { %p198_p6 = por %p197_p5, %p196_p4 }
   0xe   :  { %p199_p7 = pnand %p198_p6, %p192_p3 }
  0x10   :  { %202 = shalt.err (!%p199_p7)
}
  0x11   :  { %s254_s19 = smov 128   ;;  %s255_s20 = smov 8  }
  0x12   :  { %26 = dma.hbm_to_vmem [thread:$0]  %s309_s0, 384, %s21_s10, [#allocation4], %s254_s19, %s254_s19, %s255_s20  }
  0x13   :  { %s256_s23 = smov [#allocation6]   ;;  %s203_s27 = scalar_lea.hbm %s310_s1, 384 }
  0x14   :  { %s37_s24 = sshll.u32 %s256_s23, 4  ;;  %p204_p8 = scmp.ne.s32.totalorder %s310_s1, %s203_s27  ;;  %s38_s24 = int_to_ptr.vmem [resolvable:$true] %s37_s24 }
  0x15   :  { %p207_p9 = scmp.lt.u32.totalorder %s203_s27, %s310_s1 }
  0x17   :  { %p209_p10 = pnand %p207_p9, %p204_p8 }
  0x19   :  { %212 = shalt.err (!%p209_p10)
}
  0x1a   :  { %s213_s4 = scalar_lea.vmem %s38_s24, 384  ;;  %p218_p12 = scmp.lt.s32.totalorder %s38_s24, %s38_s24 }
  0x1b   :  { %p214_p11 = scmp.ne.s32.totalorder %s38_s24, %s213_s4  ;;  %p219_p13 = scmp.lt.s32.totalorder %s213_s4, %s213_s4 }
  0x1d   :  { %p220_p0 = por %p219_p13, %p218_p12 }
  0x1f   :  { %p221_p1 = pnand %p220_p0, %p214_p11 }
  0x21   :  { %224 = shalt.err (!%p221_p1)
}
  0x22   :  { %43 = dma.hbm_to_vmem [thread:$0]  %s310_s1, 384, %s38_s24, [#allocation7], %s254_s19, %s254_s19, %s255_s20  }
  0x23   :  { %247 = dma.done.wait [#allocation4], 384  }
  0x24   :  { %248 = vsyncadd [#allocation4], 4294966912 }
  0x25   :  { %249 = dma.done.wait [#allocation7], 384  }
  0x26   :  { %250 = vsyncadd [#allocation7], 4294966912  ;;  %v62_v0 = vld [vmem:[#allocation3] sm:$0xff]  ;;  %v63_v1 = vld [vmem:[#allocation3 + $0x8] sm:$0xff]  ;;  %v118_v37 = vlaneseq  ;;  %s257_s1 = smov [#allocation8]  }
  0x27   :  { %v64_v2 = vld [vmem:[#allocation3 + $0x10] sm:$0xff]  ;;  %v65_v3 = vld [vmem:[#allocation6] sm:$0xff]  ;;  %v66_v4 = vld [vmem:[#allocation6 + $0x8] sm:$0xff]  ;;  %v73_v6 = vmul.f32 %v62_v0, %v62_v0  ;;  %v74_v7 = vmul.f32 %v63_v1, %v63_v1  ;;  %s154_s6 = sshll.u32 %s257_s1, 4  ;;  %s155_s6 = int_to_ptr.vmem [resolvable:$true] %s154_s6 }
  0x28   :  { %v67_v5 = vld [vmem:[#allocation6 + $0x10] sm:$0xff]  ;;  %v75_v8 = vmul.f32 %v64_v2, %v64_v2  ;;  %v78_v9 = vmul.f32 %v65_v3, %v65_v3  ;;  %v79_v11 = vmul.f32 %v66_v4, %v66_v4  ;;  %v68_v17 = vmul.f32 %v65_v3, %v62_v0  ;;  %s225_s8 = scalar_lea.vmem %s155_s6, 128  ;;  %p230_p3 = scmp.lt.s32.totalorder %s155_s6, %s155_s6 }
  0x29   :  { %v76_v10 = vadd.f32 %v74_v7, %v73_v6  ;;  %v80_v12 = vmul.f32 %v67_v5, %v67_v5  ;;  %v69_v18 = vmul.f32 %v66_v4, %v63_v1  ;;  %v70_v19 = vmul.f32 %v67_v5, %v64_v2  ;;  %p226_p2 = scmp.ne.s32.totalorder %s155_s6, %s225_s8  ;;  %p231_p4 = scmp.lt.s32.totalorder %s225_s8, %s225_s8 }
  0x2a   :  { %v81_v14 = vadd.f32 %v79_v11, %v78_v9  ;;  %v124_v42 = vshrl.u32 %v118_v37, 7  ;;  %v119_v45 = vand.u32 127, %v118_v37 }
  0x2b   :  { %v77_v13 = vadd.f32 %v76_v10, %v75_v8  ;;  %v71_v20 = vadd.f32 %v69_v18, %v68_v17  ;;  %p232_p5 = por %p231_p4, %p230_p3 }
  0x2c   :  { %v82_v15 = vadd.f32 %v81_v14, %v80_v12  ;;  %v125_v48 = vmul.u32 128, %v124_v42 }
  0x2d   :  { %v72_v21 = vadd.f32 %v71_v20, %v70_v19  ;;  %p233_p6 = pnand %p232_p5, %p226_p2 }
  0x2e   :  { %v83_v16 = vmul.f32 %v82_v15, %v77_v13  ;;  %v126_v52 = vadd.s32 %v125_v48, %v119_v45 }
  0x30   :  { %177 = vrsqrt.f32 %v83_v16  ;;  %vm127_vm3 = vcmp.lt.s32.totalorder %v126_v52, 16 }
  0x3a   :  { %v178_v22 = vpop.eup %177 }
  0x3b   :  { %v85_v23 = vmin.f32 %v178_v22, 1e+16 }
  0x3d   :  { %v86_v24 = vmul.f32 %v85_v23, %v72_v21 }
  0x3f   :  { %v168_v25 = vclamps-f32 %v86_v24, 1.0 }
  0x41   :  { %v89_v26 = vand.u32 2147483647, %v168_v25  ;;  %vm114_vm2 = vcmp.lt.f32.partialorder %v168_v25, 0.0 }
  0x43   :  { %v90_v27 = vmul.f32 -0.0012624911, %v89_v26  ;;  %v104_v28 = vsub.f32 1.0, %v89_v26 }
  0x45   :  { %v91_v29 = vadd.f32 0.00667009, %v90_v27  ;;  %v105_v30 = vmax.f32 %v104_v28, 0.0 }
  0x47   :  { %v92_v31 = vmul.f32 %v91_v29, %v89_v26  ;;  %179 = vrsqrt.f32 %v105_v30  ;;  %vm108_vm0 = vcmp.eq.f32.partialorder %v105_v30, inf  ;;  %v111_v44 = vand.u32 2147483648, %v105_v30 }
  0x48   :  { %vm110_vm1 = vcmp.eq.f32.partialorder %v105_v30, 0.0 }
  0x49   :  { %v93_v32 = vadd.f32 -0.017088126, %v92_v31 }
  0x4b   :  { %v94_v33 = vmul.f32 %v93_v32, %v89_v26 }
  0x4d   :  { %v95_v34 = vadd.f32 0.03089188, %v94_v33 }
  0x4f   :  { %v96_v35 = vmul.f32 %v95_v34, %v89_v26 }
  0x51   :  { %v97_v36 = vadd.f32 -0.050174303, %v96_v35  ;;  %v180_v38 = vpop.eup %179 }
  0x52   :  { %v107_v41 = vmul.f32 %v180_v38, %v105_v30 }
  0x53   :  { %v98_v39 = vmul.f32 %v97_v36, %v89_v26 }
  0x54   :  { %v109_v47 = vsel %vm108_vm0, %v105_v30, %v107_v41 }
  0x55   :  { %v99_v40 = vadd.f32 0.08897899, %v98_v39  ;;  %v112_v50 = vsel %vm110_vm1, %v111_v44, %v109_v47 }
  0x57   :  { %v100_v43 = vmul.f32 %v99_v40, %v89_v26 }
  0x59   :  { %v101_v46 = vadd.f32 -0.2145988, %v100_v43 }
  0x5b   :  { %v102_v49 = vmul.f32 %v101_v46, %v89_v26 }
  0x5d   :  { %v103_v51 = vadd.f32 1.5707963, %v102_v49 }
  0x5f   :  { %v113_v53 = vmul.f32 %v112_v50, %v103_v51 }
  0x61   :  { %v115_v54 = vsub.f32 3.1415927, %v113_v53 }
  0x63   :  { %v116_v55 = vsel %vm114_vm2, %v115_v54, %v113_v53 }
  0x64   :  { %v128_v56 = vsel %vm127_vm3, %v116_v55, 0.0 }
  0x65   :  { %136 = vadd.xlane.f32.xlu0 %v128_v56 }
  0xf2   :  { %v137_v57 = vpop.xlane.xlu0 %136 }
  0xf3   :  { %v138_v58 = vrot.slane %v137_v57, 4 }
  0xf5   :  { %v139_v59 = vadd.f32 %v138_v58, %v137_v57 }
  0xf7   :  { %v140_v60 = vrot.slane %v139_v59, 2 }
  0xf9   :  { %v141_v61 = vadd.f32 %v140_v60, %v139_v59 }
  0xfb   :  { %v142_v62 = vrot.slane %v141_v61, 1 }
  0xfd   :  { %v143_v63 = vadd.f32 %v142_v62, %v141_v61 }
  0xff   :  { %169 = vpush %v143_v63 }
 0x130   :  { %s170_s7 = spop %169 }
 0x131   :  { %v145_v0 = vstv %s170_s7 }
 0x132   :  { %v146_v1 = vmul.f32 3.5809863, %v145_v0 }
 0x134   :  { %147 = vst [vmem:[#allocation8] sm:$0xff] %v146_v1 }
 0x135   :  { %236 = shalt.err (!%p233_p6)
}
 0x136   :  { %s237_s11 = scalar_lea.hbm %s311_s2, 128 }
 0x137   :  { %p238_p7 = scmp.ne.s32.totalorder %s311_s2, %s237_s11  ;;  %p241_p8 = scmp.lt.u32.totalorder %s237_s11, %s311_s2 }
 0x139   :  { %p243_p9 = pnand %p241_p8, %p238_p7 }
 0x13b   :  { %246 = shalt.err (!%p243_p9)
}
 0x13c   :  { %157 = dma.vmem_to_hbm [thread:$0]  %s155_s6, 128, %s311_s2, [#allocation5]  }
 0x13d   :  { %251 = dma.done.wait [#allocation5], 128  }
 0x13e   :  { %252 = vsyncadd [#allocation5], 4294967168 }
 0x13f   :  { %161 = vsyncpa [#allocation4], 1 }
 0x140   :  { %162 = vsyncpa [#allocation7], 1 }
 0x141   :  { %163 = vsyncpa [#allocation5], 1 }

</bundles_post_ra>
